<compile_context>
chip_gen: v6e
topology: v6e:2x2x1
jax: 0.10.0
libtpu: 0.0.40
codegen_flags: <defaults>
</compile_context>

<pallas_src>
import functools
import math

import jax
import jax.numpy as jnp
from jax.experimental import pallas as pl
from jax.experimental.pallas import tpu as pltpu


def _round_up(x, m):
    return (x + m - 1) // m * m


def _fused_gcn_kernel(a_ref, x0_hbm, w_ref, b_ref, o_ref,
                      x_cur, xw_buf, acc_ref, x0_sem, *, tm, tk):
    """One grid step handles (layer l, row tile i, column tile k).

    a_ref  : (tm, tk)     A_norm block: rows [i*tm, ...) x cols [k*tk, ...)
    x0_hbm : (Np, Fp)     initial node features (HBM, copied once)
    w_ref  : (1, Fp, Fp)  layer-l weight
    b_ref  : (1, 1, Fp)   layer-l bias (f32)
    o_ref  : (tm, Fp)     output rows (written on the last layer only)
    x_cur  : (Np, Fp)     VMEM scratch: current layer's input activations
    xw_buf : (Np, Fp)     VMEM scratch: X_l @ W_l, filled chunk-by-chunk
    acc_ref: (tm, Fp)     f32 accumulator for this row tile
    x0_sem : DMA semaphore for the one-time X0 copy
    """
    l = pl.program_id(0)
    i = pl.program_id(1)
    k = pl.program_id(2)
    num_layers = pl.num_programs(0)
    n_k = pl.num_programs(2)

    # One-time load of the initial features into the activation scratch.
    @pl.when(jnp.logical_and(l == 0, jnp.logical_and(i == 0, k == 0)))
    def _():
        cp = pltpu.make_async_copy(x0_hbm, x_cur, x0_sem)
        cp.start()
        cp.wait()

    # Distributed feature transform: chunk k of X_l @ W_l is produced while
    # row tile 0 of layer l is being aggregated.  xw_buf is therefore complete
    # before any x_cur rows of layer l get overwritten (that only happens at a
    # row tile's k==last finalize step, after this chunk has been written).
    @pl.when(i == 0)
    def _():
        r0 = pl.multiple_of(k * tk, tk)
        chunk = jnp.dot(x_cur[pl.ds(r0, tk), :], w_ref[0],
                        preferred_element_type=jnp.float32)
        xw_buf[pl.ds(r0, tk), :] = chunk.astype(xw_buf.dtype)

    # Zero the f32 accumulator at the start of every (layer, row tile).
    @pl.when(k == 0)
    def _():
        acc_ref[...] = jnp.zeros_like(acc_ref)

    # Neighborhood aggregation: A[i, k] @ XW[k] with f32 MXU accumulation.
    # TODO(synk): with PrefetchScalarGridSpec, walk a compacted nonzero-tile
    # list so all-zero (tm, tk) A tiles are skipped (block-sparse A) -- the
    # biggest win on real (sparse) graphs.
    c0 = pl.multiple_of(k * tk, tk)
    acc_ref[...] += jnp.dot(a_ref[...], xw_buf[pl.ds(c0, tk), :],
                            preferred_element_type=jnp.float32)

    # Finalize this row tile once all K column tiles have been accumulated.
    @pl.when(k == n_k - 1)
    def _():
        out = acc_ref[...] + b_ref[0]

        @pl.when(l < num_layers - 1)          # ReLU + carry to next layer
        def _():
            act = jnp.maximum(out, 0.0)
            r0 = pl.multiple_of(i * tm, tm)
            x_cur[pl.ds(r0, tm), :] = act.astype(x_cur.dtype)

        @pl.when(l == num_layers - 1)         # final layer: emit scores
        def _():
            o_ref[...] = out.astype(o_ref.dtype)


def gcn_forward(a_norm, x, w_stack, b_stack, *, compute_dtype=jnp.bfloat16,
                tile_m=None, tile_k=None):
    """Fused forward pass of the whole GCN stack in one pallas_call.

    a_norm  : [N, N]  f32 normalized adjacency
    x       : [N, F]  f32 node features
    w_stack : [L, Fp, Fp] zero-padded weights (f32)
    b_stack : [L, 1, Fp]  zero-padded biases (f32)
    returns : [N, 1]  f32 node scores
    """
    n = x.shape[0]
    num_layers, fp, _ = w_stack.shape

    # VMEM capacity drives tile sizes and the declared limit
    # (v7x: 64 MiB physical; v5e/v6e: 128 MiB).
    try:
        info = pltpu.get_tpu_info()
        vmem_cap = int(getattr(info, "vmem_capacity_bytes", 64 << 20))
    except Exception:  # conservative fallback
        vmem_cap = 64 << 20

    if tile_m is None:
        tile_m = _round_up(n, 128) if n <= 512 else (
            512 if vmem_cap >= (96 << 20) else 256)
    if tile_k is None:
        tile_k = _round_up(n, 128) if n <= 512 else 512
    tm, tk = int(tile_m), int(tile_k)
    np_pad = _round_up(n, math.lcm(tm, tk))
    n_i, n_k = np_pad // tm, np_pad // tk

    itemsize = jnp.dtype(compute_dtype).itemsize
    # TODO(synk): quantize A to fp8 (v7x) / int8 (v5e-v6e) with a global scale
    # to halve/quarter the dominant L*N^2 HBM stream; bf16 is the portable
    # default kept here.
    a_p = jnp.zeros((np_pad, np_pad), compute_dtype).at[:n, :n].set(
        a_norm.astype(compute_dtype))
    x_p = jnp.zeros((np_pad, fp), compute_dtype).at[:n, :x.shape[1]].set(
        x.astype(compute_dtype))
    w_p = w_stack.astype(compute_dtype)
    b_p = b_stack.astype(jnp.float32)

    kernel = functools.partial(_fused_gcn_kernel, tm=tm, tk=tk)

    cost = pl.CostEstimate(
        flops=int(2 * num_layers * (np_pad * fp * fp + np_pad * np_pad * fp)),
        transcendentals=0,
        bytes_accessed=int(num_layers * a_p.size * itemsize
                           + x_p.size * itemsize
                           + w_p.size * itemsize
                           + b_p.size * 4
                           + np_pad * fp * 4))

    needed = (2 * tm * tk * itemsize          # A tile (double buffered)
              + 2 * fp * fp * itemsize        # W_l (double buffered)
              + 2 * fp * 4                    # b_l
              + 2 * tm * fp * 4               # out tile (double buffered)
              + 2 * np_pad * fp * itemsize    # x_cur + xw_buf scratch
              + tm * fp * 4                   # f32 accumulator
              + (4 << 20))                    # compiler headroom
    vmem_limit = int(min(max(needed, 32 << 20), int(vmem_cap * 0.8)))

    out_p = pl.pallas_call(
        kernel,
        out_shape=jax.ShapeDtypeStruct((np_pad, fp), jnp.float32),
        grid=(num_layers, n_i, n_k),
        in_specs=[
            pl.BlockSpec((tm, tk), lambda l, i, k: (i, k)),        # A block
            pl.BlockSpec(memory_space=pl.ANY),                     # X0 (HBM)
            pl.BlockSpec((1, fp, fp), lambda l, i, k: (l, 0, 0)),  # W_l
            pl.BlockSpec((1, 1, fp), lambda l, i, k: (l, 0, 0)),   # b_l
        ],
        out_specs=pl.BlockSpec((tm, fp), lambda l, i, k: (i, 0)),
        scratch_shapes=[
            pltpu.VMEM((np_pad, fp), compute_dtype),   # x_cur (activations)
            pltpu.VMEM((np_pad, fp), compute_dtype),   # xw_buf (X_l @ W_l)
            pltpu.VMEM((tm, fp), jnp.float32),         # f32 accumulator
            pltpu.SemaphoreType.DMA(()),               # one-time X0 copy
        ],
        compiler_params=pltpu.CompilerParams(
            # Every axis carries state through the VMEM scratch buffers, so
            # all must stay sequential on one core.
            # TODO(synk): on v7x split the row-tile axis across both
            # TensorCores (pl.core_map) with a per-layer half-activation
            # exchange through VMEM_SHARED/CMEM.
            dimension_semantics=("arbitrary", "arbitrary", "arbitrary"),
            vmem_limit_bytes=vmem_limit),
        cost_estimate=cost,
    )(a_p, x_p, w_p, b_p)

    return out_p[:n, :1]


def build_normalized_adjacency(edge_index, num_nodes):
    """Dense D^-1/2 (A + I) D^-1/2 from a [2, E] edge_index (source, target).

    Matches torch_geometric GCNConv defaults (add_self_loops=True,
    normalize=True); parallel edges are summed, not deduplicated.
    """
    src, dst = edge_index[0], edge_index[1]
    a = jnp.zeros((num_nodes, num_nodes), jnp.float32)
    a = a.at[dst, src].add(1.0)                      # message flows src -> dst
    a = a + jnp.eye(num_nodes, dtype=jnp.float32)    # self loops, weight 1
    deg = a.sum(axis=1)
    dinv = jnp.where(deg > 0, jax.lax.rsqrt(deg), 0.0)
    return a * dinv[:, None] * dinv[None, :]


def init_params(key, input_dim, hidden_dim, num_layers):
    """GCNConv params: glorot weight [in, out], zero bias [out]."""
    dims = [input_dim] + [hidden_dim] * (num_layers - 1) + [1]
    params = []
    for i in range(num_layers):
        key, sub = jax.random.split(key)
        f_in, f_out = dims[i], dims[i + 1]
        limit = jnp.sqrt(6.0 / (f_in + f_out))
        w = jax.random.uniform(sub, (f_in, f_out), jnp.float32, -limit, limit)
        b = jnp.zeros((f_out,), jnp.float32)
        params.append((w, b))
    return params


def stack_padded_params(params, feature_pad):
    """Stack per-layer (W, b) into zero-padded [L, Fp, Fp] / [L, 1, Fp]."""
    num_layers = len(params)
    w_stack = jnp.zeros((num_layers, feature_pad, feature_pad), jnp.float32)
    b_stack = jnp.zeros((num_layers, 1, feature_pad), jnp.float32)
    for l, (w, b) in enumerate(params):
        w_stack = w_stack.at[l, :w.shape[0], :w.shape[1]].set(w)
        b_stack = b_stack.at[l, 0, :b.shape[0]].set(b)
    return w_stack, b_stack


def gcn_score_model(x, edge_index, params, *, compute_dtype=jnp.bfloat16,
                    tile_m=None, tile_k=None):
    """Forward pass matching GCNScoreModel.forward (ReLU on all but last layer).

    NOTE: build_normalized_adjacency is O(N^2) plain-JAX glue that only
    depends on the graph; for repeated forward passes on the same graph,
    build A_norm once and call gcn_forward directly.
    """
    input_dim = x.shape[1]
    if len(params) > 1:
        hidden_dim = max(w.shape[1] for w, _ in params[:-1])
    else:
        hidden_dim = params[0][0].shape[1]
    fp = _round_up(max(input_dim, hidden_dim, 1), 128)
    a_norm = build_normalized_adjacency(edge_index, x.shape[0])
    w_stack, b_stack = stack_padded_params(params, fp)
    return gcn_forward(a_norm, x, w_stack, b_stack,
                       compute_dtype=compute_dtype,
                       tile_m=tile_m, tile_k=tile_k)


if __name__ == "__main__":
    key = jax.random.PRNGKey(0)

    def reference(x, a_norm, params):
        h = x
        for w, b in params[:-1]:
            h = jnp.maximum(a_norm @ (h @ w) + b[None, :], 0.0)
        w, b = params[-1]
        return a_norm @ (h @ w) + b[None, :]

    def make_graph(num_nodes):
        # Deterministic undirected ring + chords as edge_index [2, E].
        src = jnp.arange(num_nodes, dtype=jnp.int32)
        dst = (src + 1) % num_nodes
        chords_s = jnp.arange(0, num_nodes // 2, 3, dtype=jnp.int32)
        chords_d = (chords_s + num_nodes // 2) % num_nodes
        s_all = jnp.concatenate([src, dst, chords_s, chords_d])
        d_all = jnp.concatenate([dst, src, chords_d, chords_s])
        return jnp.stack([s_all, d_all], axis=0)

    input_dim, hidden_dim, num_layers = 8, 32, 3

    # --- Test 1: small graph (single-tile path, 16 nodes) -----------------
    num_nodes = 16
    k_x, k_p, key = jax.random.split(key, 3)
    x = jax.random.normal(k_x, (num_nodes, input_dim), jnp.float32)
    edge_index = make_graph(num_nodes)
    params = init_params(k_p, input_dim, hidden_dim, num_layers)
    a_norm = build_normalized_adjacency(edge_index, num_nodes)
    ref = reference(x, a_norm, params)

    scores_f32 = gcn_score_model(x, edge_index, params,
                                 compute_dtype=jnp.float32)
    jax.block_until_ready(scores_f32)
    assert scores_f32.shape == (num_nodes, 1)
    assert jnp.allclose(scores_f32, ref, atol=1e-4, rtol=1e-4)

    scores_bf16 = gcn_score_model(x, edge_index, params)
    jax.block_until_ready(scores_bf16)
    assert scores_bf16.shape == (num_nodes, 1)
    assert jnp.allclose(scores_bf16, ref, atol=5e-2, rtol=5e-2)

    # --- Test 2: multi-tile grid (row + column tiling of A, 256 nodes) ----
    num_nodes2 = 256
    k_x2, k_p2, key = jax.random.split(key, 3)
    x2 = jax.random.normal(k_x2, (num_nodes2, input_dim), jnp.float32)
    edge_index2 = make_graph(num_nodes2)
    params2 = init_params(k_p2, input_dim, hidden_dim, num_layers)
    a_norm2 = build_normalized_adjacency(edge_index2, num_nodes2)
    ref2 = reference(x2, a_norm2, params2)

    scores2_f32 = gcn_score_model(x2, edge_index2, params2,
                                  compute_dtype=jnp.float32,
                                  tile_m=128, tile_k=128)
    jax.block_until_ready(scores2_f32)
    assert scores2_f32.shape == (num_nodes2, 1)
    assert jnp.allclose(scores2_f32, ref2, atol=1e-4, rtol=1e-4)

    scores2_bf16 = gcn_score_model(x2, edge_index2, params2,
                                   tile_m=128, tile_k=128)
    jax.block_until_ready(scores2_bf16)
    assert scores2_bf16.shape == (num_nodes2, 1)
    assert jnp.allclose(scores2_bf16, ref2, atol=5e-2, rtol=5e-2)

    print("KERNEL_OK")
</pallas_src>

<mosaic_0001>
module attributes {stable_mosaic.version = 11 : i64} {
  func.func @_fused_gcn_kernel(%arg0: i32, %arg1: i32, %arg2: i32, %arg3: memref<128x128xf32, #tpu.memory_space<vmem>>, %arg4: memref<128x128xf32, #tpu.memory_space<any>>, %arg5: memref<1x128x128xf32, #tpu.memory_space<vmem>>, %arg6: memref<1x1x128xf32, #tpu.memory_space<vmem>>, %arg7: memref<128x128xf32, #tpu.memory_space<vmem>>, %arg8: memref<128x128xf32, #tpu.memory_space<vmem>>, %arg9: memref<128x128xf32, #tpu.memory_space<vmem>>, %arg10: memref<128x128xf32, #tpu.memory_space<vmem>>, %arg11: memref<!tpu.dma_semaphore, #tpu.memory_space<semaphore_mem>>) attributes {dimension_semantics = [#tpu.dimension_semantics<arbitrary>, #tpu.dimension_semantics<arbitrary>, #tpu.dimension_semantics<arbitrary>], iteration_bounds = array<i64: 3, 1, 1>, scalar_prefetch = 0 : i64, scratch_operands = 4 : i64, tpu.core_type = #tpu.core_type<tc>, window_params = [{transform_indices = @transform_0, window_bounds = array<i64: 128, 128>}, {}, {transform_indices = @transform_2, window_bounds = array<i64: 1, 128, 128>}, {transform_indices = @transform_3, window_bounds = array<i64: 1, 1, 128>}, {transform_indices = @transform_4, window_bounds = array<i64: 128, 128>}]} {
    %c0_i32 = arith.constant 0 : i32
    %0 = arith.cmpi eq, %arg0, %c0_i32 : i32
    %c0_i32_0 = arith.constant 0 : i32
    %1 = arith.cmpi eq, %arg1, %c0_i32_0 : i32
    %c0_i32_1 = arith.constant 0 : i32
    %2 = arith.cmpi eq, %arg2, %c0_i32_1 : i32
    %3 = arith.andi %1, %2 : i1
    %4 = arith.andi %0, %3 : i1
    %5 = arith.extui %4 : i1 to i32
    %c0_i32_2 = arith.constant 0 : i32
    %6 = arith.cmpi ne, %5, %c0_i32_2 : i32
    scf.if %6 {
      tpu.enqueue_dma source(%arg4 : memref<128x128xf32, #tpu.memory_space<any>>) target(%arg8 : memref<128x128xf32, #tpu.memory_space<vmem>>) target_semaphore(%arg11 : memref<!tpu.dma_semaphore, #tpu.memory_space<semaphore_mem>>)
      tpu.wait_dma2 semaphore(%arg11 : memref<!tpu.dma_semaphore, #tpu.memory_space<semaphore_mem>>) src(%arg4 : memref<128x128xf32, #tpu.memory_space<any>>) dst(%arg8 : memref<128x128xf32, #tpu.memory_space<vmem>>)
    } else {
    }
    %c0_i32_3 = arith.constant 0 : i32
    %7 = arith.cmpi eq, %arg1, %c0_i32_3 : i32
    %8 = arith.extui %7 : i1 to i32
    %c0_i32_4 = arith.constant 0 : i32
    %9 = arith.cmpi ne, %8, %c0_i32_4 : i32
    scf.if %9 {
      %c128_i32_15 = arith.constant 128 : i32
      %25 = arith.muli %arg2, %c128_i32_15 : i32
      %26 = tpu.assume_multiple %25, 128 : i32
      %27 = arith.index_cast %26 : i32 to index
      %c0_16 = arith.constant 0 : index
      %28 = vector.load %arg8[%27, %c0_16] : memref<128x128xf32, #tpu.memory_space<vmem>>, vector<128x128xf32>
      %c0_17 = arith.constant 0 : index
      %c0_18 = arith.constant 0 : index
      %c0_19 = arith.constant 0 : index
      %29 = vector.load %arg5[%c0_17, %c0_18, %c0_19] : memref<1x128x128xf32, #tpu.memory_space<vmem>>, vector<1x128x128xf32>
      %30 = vector.shape_cast %29 : vector<1x128x128xf32> to vector<128x128xf32>
      %cst_20 = arith.constant dense<0.000000e+00> : vector<128x128xf32>
      %31 = tpu.matmul %28, %30, %cst_20 {dimension_numbers = #tpu.dot_dimension_numbers<[1], [0], [0], [1], [0, 0, 1, 1], [], []>} : vector<128x128xf32>, vector<128x128xf32>, vector<128x128xf32> -> vector<128x128xf32>
      %32 = arith.index_cast %26 : i32 to index
      %c0_21 = arith.constant 0 : index
      %33 = vector.load %arg9[%32, %c0_21] : memref<128x128xf32, #tpu.memory_space<vmem>>, vector<128x128xf32>
      tpu.vector_store %arg9[%32, %c0_21], %31 {strides = array<i32>} : memref<128x128xf32, #tpu.memory_space<vmem>>, vector<128x128xf32>,
    } else {
    }
    %c0_i32_5 = arith.constant 0 : i32
    %10 = arith.cmpi eq, %arg2, %c0_i32_5 : i32
    %11 = arith.extui %10 : i1 to i32
    %c0_i32_6 = arith.constant 0 : i32
    %12 = arith.cmpi ne, %11, %c0_i32_6 : i32
    scf.if %12 {
      %cst_15 = arith.constant 0.000000e+00 : f32
      %25 = vector.broadcast %cst_15 : f32 to vector<128x128xf32>
      %c0_16 = arith.constant 0 : index
      %c0_17 = arith.constant 0 : index
      %26 = vector.load %arg10[%c0_16, %c0_17] : memref<128x128xf32, #tpu.memory_space<vmem>>, vector<128x128xf32>
      tpu.vector_store %arg10[%c0_16, %c0_17], %25 {strides = array<i32>} : memref<128x128xf32, #tpu.memory_space<vmem>>, vector<128x128xf32>,
    } else {
    }
    %c128_i32 = arith.constant 128 : i32
    %13 = arith.muli %arg2, %c128_i32 : i32
    %14 = tpu.assume_multiple %13, 128 : i32
    %c0 = arith.constant 0 : index
    %c0_7 = arith.constant 0 : index
    %15 = vector.load %arg10[%c0, %c0_7] : memref<128x128xf32, #tpu.memory_space<vmem>>, vector<128x128xf32>
    %c0_8 = arith.constant 0 : index
    %c0_9 = arith.constant 0 : index
    %16 = vector.load %arg3[%c0_8, %c0_9] : memref<128x128xf32, #tpu.memory_space<vmem>>, vector<128x128xf32>
    %17 = arith.index_cast %14 : i32 to index
    %c0_10 = arith.constant 0 : index
    %18 = vector.load %arg9[%17, %c0_10] : memref<128x128xf32, #tpu.memory_space<vmem>>, vector<128x128xf32>
    %cst = arith.constant dense<0.000000e+00> : vector<128x128xf32>
    %19 = tpu.matmul %16, %18, %cst {dimension_numbers = #tpu.dot_dimension_numbers<[1], [0], [0], [1], [0, 0, 1, 1], [], []>} : vector<128x128xf32>, vector<128x128xf32>, vector<128x128xf32> -> vector<128x128xf32>
    %20 = arith.addf %15, %19 : vector<128x128xf32>
    %c0_11 = arith.constant 0 : index
    %c0_12 = arith.constant 0 : index
    %21 = vector.load %arg10[%c0_11, %c0_12] : memref<128x128xf32, #tpu.memory_space<vmem>>, vector<128x128xf32>
    tpu.vector_store %arg10[%c0_11, %c0_12], %20 {strides = array<i32>} : memref<128x128xf32, #tpu.memory_space<vmem>>, vector<128x128xf32>,
    %c0_i32_13 = arith.constant 0 : i32
    %22 = arith.cmpi eq, %arg2, %c0_i32_13 : i32
    %23 = arith.extui %22 : i1 to i32
    %c0_i32_14 = arith.constant 0 : i32
    %24 = arith.cmpi ne, %23, %c0_i32_14 : i32
    scf.if %24 {
      %c0_15 = arith.constant 0 : index
      %c0_16 = arith.constant 0 : index
      %25 = vector.load %arg10[%c0_15, %c0_16] : memref<128x128xf32, #tpu.memory_space<vmem>>, vector<128x128xf32>
      %c0_17 = arith.constant 0 : index
      %c0_18 = arith.constant 0 : index
      %c0_19 = arith.constant 0 : index
      %26 = vector.load %arg6[%c0_17, %c0_18, %c0_19] : memref<1x1x128xf32, #tpu.memory_space<vmem>>, vector<1x1x128xf32>
      %27 = vector.shape_cast %26 : vector<1x1x128xf32> to vector<1x128xf32>
      %28 = vector.broadcast %27 : vector<1x128xf32> to vector<128x128xf32>
      %29 = arith.addf %25, %28 : vector<128x128xf32>
      %c2_i32 = arith.constant 2 : i32
      %30 = arith.cmpi slt, %arg0, %c2_i32 : i32
      %31 = arith.extui %30 : i1 to i32
      %c0_i32_20 = arith.constant 0 : i32
      %32 = arith.cmpi ne, %31, %c0_i32_20 : i32
      scf.if %32 {
        %cst_23 = arith.constant 0.000000e+00 : f32
        %36 = vector.broadcast %cst_23 : f32 to vector<128x128xf32>
        %37 = arith.maximumf %29, %36 : vector<128x128xf32>
        %c128_i32_24 = arith.constant 128 : i32
        %38 = arith.muli %arg1, %c128_i32_24 : i32
        %39 = tpu.assume_multiple %38, 128 : i32
        %40 = arith.index_cast %39 : i32 to index
        %c0_25 = arith.constant 0 : index
        %41 = vector.load %arg8[%40, %c0_25] : memref<128x128xf32, #tpu.memory_space<vmem>>, vector<128x128xf32>
        tpu.vector_store %arg8[%40, %c0_25], %37 {strides = array<i32>} : memref<128x128xf32, #tpu.memory_space<vmem>>, vector<128x128xf32>,
      } else {
      }
      %c2_i32_21 = arith.constant 2 : i32
      %33 = arith.cmpi eq, %arg0, %c2_i32_21 : i32
      %34 = arith.extui %33 : i1 to i32
      %c0_i32_22 = arith.constant 0 : i32
      %35 = arith.cmpi ne, %34, %c0_i32_22 : i32
      scf.if %35 {
        %c0_23 = arith.constant 0 : index
        %c0_24 = arith.constant 0 : index
        %36 = vector.load %arg7[%c0_23, %c0_24] : memref<128x128xf32, #tpu.memory_space<vmem>>, vector<128x128xf32>
        tpu.vector_store %arg7[%c0_23, %c0_24], %29 {strides = array<i32>} : memref<128x128xf32, #tpu.memory_space<vmem>>, vector<128x128xf32>,
      } else {
      }
    } else {
    }
    return
  }
  func.func @transform_0(%arg0: i32, %arg1: i32, %arg2: i32) -> (i32, i32) {
    %c0_i32 = arith.constant 0 : i32
    return %arg1, %arg2 : i32, i32
  }
  func.func @transform_2(%arg0: i32, %arg1: i32, %arg2: i32) -> (i32, i32, i32) {
    %c0_i32 = arith.constant 0 : i32
    %c0_i32_0 = arith.constant 0 : i32
    %c0_i32_1 = arith.constant 0 : i32
    return %arg0, %c0_i32, %c0_i32_0 : i32, i32, i32
  }
  func.func @transform_3(%arg0: i32, %arg1: i32, %arg2: i32) -> (i32, i32, i32) {
    %c0_i32 = arith.constant 0 : i32
    %c0_i32_0 = arith.constant 0 : i32
    %c0_i32_1 = arith.constant 0 : i32
    return %arg0, %c0_i32, %c0_i32_0 : i32, i32, i32
  }
  func.func @transform_4(%arg0: i32, %arg1: i32, %arg2: i32) -> (i32, i32) {
    %c0_i32 = arith.constant 0 : i32
    %c0_i32_0 = arith.constant 0 : i32
    return %arg1, %c0_i32 : i32, i32
  }
}

</mosaic_0001>

<bundles_post_ra>
// kernel: tpu_custom_call.1
= control target key start
LH: loop header
LB: loop body
LE: loop exit
PB: predicated region body
PF: predicated region fallthrough
CT: control target
= control target key end

     0   :  { %9 = vsyncpa [#allocation7], 0  ;;  %s1609_s0 = inlined_call_operand.hbm [shape: f32[128,128], index: 0, kind: input, shape index: {}]   ;;  %s1610_s1 = inlined_call_operand.hbm [shape: f32[128,128], index: 1, kind: input, shape index: {}]   ;;  %s1611_s2 = inlined_call_operand.hbm [shape: f32[3,128,128], index: 2, kind: input, shape index: {}]   ;;  %s1612_s3 = inlined_call_operand.vmem [shape: f32[3,1,128], index: 3, kind: input, shape index: {}]   ;;  %s1613_s4 = inlined_call_operand.hbm [shape: f32[128,128], index: 4, kind: output, shape index: {}]  }
   0x1   :  { %10 = vsyncpa [#allocation10], 0 }
   0x2   :  { %12 = vsyncpa [#allocation10 + $0x1], 0 }
   0x3   :  { %13 = vsyncpa [#allocation8], 0  ;;  %s1403_s15 = smov 0   ;;  %s1405_s16 = smov 0  }
   0x4   :  { %s1407_s17 = smov 0   ;;  %s1409_s18 = smov 0  }
   0x5   :  { %s1411_s19 = smov 0   ;;  %s1413_s20 = smov 0  }
   0x6 LB: > { %s927_s21 = sadd.s32 4294967295, %s1368_s20   ;;  %p86_p0 = scmp.ne.s32.totalorder %s1352_s16, %s1348_s15  ;;  %s1368_s20 = sphi %s1413_s20, %s19_s20   ;;  %s1364_s19 = sphi %s1411_s19, %s1624_s19   ;;  %s1360_s18 = sphi %s1409_s18, %s1623_s18   ;;  %s1356_s17 = sphi %s1407_s17, %s1622_s17   ;;  %s1352_s16 = sphi %s1405_s16, %s1621_s16   ;;  %s1348_s15 = sphi %s1403_s15, %s1620_s15  }
   0x7   : > { %p1435_p1 = scmp.eq.s32.totalorder %s927_s21, 0  ;;  %p928_p2 = scmp.ge.s32.totalorder %s1368_s20, 1 }
   0x8   : > { %p149_p3 = scmp.lt.s32.totalorder %s1368_s20, 4  ;;  %s1370_s25 = smov [#allocation6]  }
   0x9   : > { %p1443_p4 = por %p1435_p1, %p86_p0  ;;  %s165_s26 = sshll.u32 %s1370_s25, 4  ;;  %s166_s26 = int_to_ptr.vmem [resolvable:$true] %s165_s26 }
   0xa   : > { %p1447_p5 = pnand %p928_p2, %p149_p3  ;;  %s38_s28 = sadd.s32 1, %s1364_s19 }
   0xb   : > { %s1215_s29 = scalar_lea.vmem %s166_s26, 2048  ;;  %p1223_p12 = scmp.lt.s32.totalorder %s166_s26, %s166_s26 }
   0xc   : > { %p1136_p6 = pneg %p1447_p5  ;;  %p1216_p9 = scmp.ne.s32.totalorder %s166_s26, %s1215_s29 }
   0xd   : > { %p1224_p13 = scmp.lt.s32.totalorder %s1215_s29, %s1215_s29 }
   0xe   : > { %p1455_p7 = pnand %p1136_p6, %p1435_p1 }
   0xf   : > { %p1225_p0 = por %p1224_p13, %p1223_p12 }
  0x10   : > { %p1206_p8 = pneg %p1455_p7 }
  0x12   : > { %p1218_p10 = pnand %p1216_p9, %p1206_p8 }
  0x14   : > { %p1219_p11 = pneg %p1218_p10 }
  0x16   : > { %p1226_p2 = pnand %p1225_p0, %p1219_p11 }
  0x18   : > { %1229 = shalt.err (!%p1226_p2)
}
  0x19   : > { %s1371_s30 = smov 128   ;;  %s1372_s5 = smov 8  }
  0x1a   : > { %1139 = dma.hbm_to_vmem [thread:$0]  (!%p1455_p7), %s1609_s0, 2048, %s166_s26, [#allocation7], %s1371_s30, %s1371_s30, %s1372_s5  }
  0x1b   : > { %p40_p3 = scmp.ge.s32.totalorder %s38_s28, 3  ;;  %s73_s8 = sadd.s32 1, %s1356_s17 }
  0x1c   : > { %p80_p6 = scmp.ne.s32.totalorder %s1356_s17, %s1352_s16  ;;  %p81_p8 = scmp.eq.s32.totalorder %s1368_s20, 0 }
  0x1d   : > { %s1626_s28 = smov (%p40_p3, %s38_s28), 0  ;;  %p1145_p10 = scmp.lt.s32.totalorder %s1368_s20, 3 }
  0x1e   : > { %p82_p9 = por %p81_p8, %p80_p6  ;;  %s70_s9 = ssub.s32 %s1364_s19, %s1626_s28 }
  0x1f   : > { %s179_s10 = sand.u32 1, %s1356_s17   ;;  %p71_p11 = scmp.eq.s32.totalorder %s70_s9, 0 }
  0x20   : > { %s931_s11 = sshll.u32 %s179_s10, 7  ;;  %s946_s12 = sshll.u32 %s1364_s19, 11 }
  0x21   : > { %s1482_s13 = scalar_select %p71_p11, %s1356_s17, %s73_s8  }
  0x22   : > { %s189_s25 = scalar_lea.hbm %s1611_s2, %s946_s12  ;;  %s183_s26 = scalar_lea.vmem [#allocation9], %s931_s11 }
  0x23   : > { %s190_s27 = sshll.u32 %s183_s26, 4  ;;  %p1487_p7 = pnand %p1145_p10, %p82_p9  ;;  %s191_s27 = int_to_ptr.vmem [resolvable:$true] %s190_s27 }
  0x24   : > { %s180_s6 = scalar_lea.sflag [#allocation10], %s179_s10  ;;  %s1243_s7 = scalar_lea.vmem %s191_s27, 2048 }
  0x25   : > { %p1232_p12 = pneg %p1487_p7  ;;  %p1244_p13 = scmp.ne.s32.totalorder %s191_s27, %s1243_s7 }
  0x26   : > { %s1373_s8 = smov [#allocation9]  }
  0x27   : > { %p1246_p0 = pnand %p1244_p13, %p1232_p12  ;;  %s1248_s9 = sshll.u32 %s1373_s8, 4  ;;  %s1249_s9 = int_to_ptr.vmem [resolvable:$false] %s1248_s9 }
  0x28   : > { %s1250_s14 = scalar_lea.vmem %s1249_s9, 4096  ;;  %p1251_p3 = scmp.lt.s32.totalorder %s191_s27, %s1249_s9 }
  0x29   : > { %p1247_p2 = pneg %p1246_p0  ;;  %p1252_p6 = scmp.lt.s32.totalorder %s1250_s14, %s1243_s7 }
  0x2b   : > { %p1253_p8 = por %p1252_p6, %p1251_p3 }
  0x2d   : > { %p1254_p9 = pnand %p1253_p8, %p1247_p2 }
  0x2f   : > { %1257 = shalt.err (!%p1254_p9)
}
  0x30   : > { %1143 = dma.hbm_to_vmem [thread:$0]  (!%p1487_p7), %s189_s25, 2048, %s191_s27, %s180_s6, %s1371_s30, %s1371_s30, %s1372_s5  }
  0x31   : > { %208 = sbr.rel (%p1447_p5) target bundleno = 626 (0x272), region = 32 }
  0x36   : > { %1331 = dma.done.wait (%p1435_p1), [#allocation7], 2048  }
  0x37   : > { %1333 = vsyncadd (%p1435_p1), [#allocation7], 4294965248  ;;  %s214_s10 = sand.u32 1, %s1352_s16  }
  0x38   : > { %s936_s11 = sshll.u32 %s214_s10, 7  ;;  %s215_s12 = scalar_lea.sflag [#allocation10], %s214_s10 }
  0x39   : > { %s1505_s15 = scalar_lea.vmem [#allocation9], %s936_s11 }
  0x3a   : > { %1335 = dma.done.wait (%p1443_p4), %s215_s12, 2048  }
  0x3b   : > { %1337 = vsyncadd (%p1443_p4), %s215_s12, 4294965248  ;;  %p240_p5 = scmp.lt.s32.totalorder %s1360_s18, 2  ;;  %p244_p10 = scmp.eq.s32.totalorder %s1360_s18, 0 }
  0x3c   : > { %s1374_s24 = smov [#allocation2]  }
  0x3d   : > { %s1514_s22 = scalar_select %p240_p5, %s1360_s18, 2 }
  0x3e   : > { %s260_s30 = sshll.u32 %s1374_s24, 4  ;;  %s261_s30 = int_to_ptr.vmem [resolvable:$true] %s260_s30 }
  0x3f   : > { %s242_s26 = scalar_lea.vmem %s1612_s3, %s1514_s22  ;;  %s1268_s27 = scalar_lea.vmem %s261_s30, 2048 }
  0x40   : > { %p1269_p1 = scmp.ne.s32.totalorder %s261_s30, %s1268_s27  ;;  %p1275_p7 = scmp.lt.s32.totalorder %s261_s30, %s261_s30 }
  0x41   : > { %p1276_p12 = scmp.lt.s32.totalorder %s1268_s27, %s1268_s27 }
  0x42   : > { %p1270_p4 = pnand %p1269_p1, %p244_p10 }
  0x43   : > { %p1277_p13 = por %p1276_p12, %p1275_p7 }
  0x44   : > { %p1271_p11 = pneg %p1270_p4 }
  0x46   : > { %p1278_p0 = pnand %p1277_p13, %p1271_p11 }
  0x48   : > { %1281 = shalt.err (!%p1278_p0)  }
  0x49   : > { %1130 = dma.hbm_to_vmem [thread:$0]  (%p244_p10), %s1610_s1, 2048, %s261_s30, [#allocation5] }
  0x4a   : > { %1339 = dma.done.wait (%p244_p10), [#allocation5], 2048 }
  0x4b   : > { %1341 = vsyncadd (%p244_p10), [#allocation5], 4294965248  ;;  %v303_v0 = vld [vmem:[%s1505_s15 + $0x78] sm:$0xff]  ;;  %v302_v1 = vld [vmem:[%s1505_s15 + $0x70] sm:$0xff]  ;;  %p939_p2 = scmp.ge.s32.totalorder %s1360_s18, 2 }
  0x4c   : > { %1012 = vmatprep.subr.mxu0 %v303_v0  ;;  %v301_v2 = vld [vmem:[%s1505_s15 + $0x68] sm:$0xff]  ;;  %v300_v3 = vld [vmem:[%s1505_s15 + $0x60] sm:$0xff]  ;;  %v299_v5 = vld [vmem:[%s1505_s15 + $0x58] sm:$0xff] }
  0x4d   : > { %1013 = vmatpush3.msra.mxu0 %v303_v0  ;;  %v272_v4 = vld [vmem:[#allocation2] sm:$0xff]  ;;  %v298_v6 = vld [vmem:[%s1505_s15 + $0x50] sm:$0xff]  ;;  %v297_v7 = vld [vmem:[%s1505_s15 + $0x48] sm:$0xff] }
  0x4e   : > { %1014 = vmatprep.subr.mxu0 %v302_v1  ;;  %1044 = vmatprep.mubr.f32.mxu0 %v272_v4  ;;  %v296_v8 = vld [vmem:[%s1505_s15 + $0x40] sm:$0xff]  ;;  %v295_v9 = vld [vmem:[%s1505_s15 + $0x38] sm:$0xff]  ;;  %v294_v10 = vld [vmem:[%s1505_s15 + $0x30] sm:$0xff] }
  0x4f   : > { %1015 = vmatpush3.msra.mxu0 %v302_v1  ;;  %v293_v11 = vld [vmem:[%s1505_s15 + $0x28] sm:$0xff]  ;;  %v292_v12 = vld [vmem:[%s1505_s15 + $0x20] sm:$0xff]  ;;  %v291_v13 = vld [vmem:[%s1505_s15 + $0x18] sm:$0xff] }
  0x50   : > { %1016 = vmatprep.subr.mxu0 %v301_v2  ;;  %v290_v14 = vld [vmem:[%s1505_s15 + $0x10] sm:$0xff]  ;;  %v289_v15 = vld [vmem:[%s1505_s15 + $0x8] sm:$0xff]  ;;  %v288_v16 = vld [vmem:[%s1505_s15] sm:$0xff] }
  0x51   : > { %1017 = vmatpush3.msra.mxu0 %v301_v2  ;;  %v273_v17 = vld [vmem:[#allocation2 + $0x8] sm:$0xff]  ;;  %v274_v18 = vld [vmem:[#allocation2 + $0x10] sm:$0xff]  ;;  %v275_v19 = vld [vmem:[#allocation2 + $0x18] sm:$0xff] }
  0x52   : > { %1018 = vmatprep.subr.mxu0 %v300_v3  ;;  %v276_v20 = vld [vmem:[#allocation2 + $0x20] sm:$0xff]  ;;  %v277_v21 = vld [vmem:[#allocation2 + $0x28] sm:$0xff]  ;;  %v278_v22 = vld [vmem:[#allocation2 + $0x30] sm:$0xff] }
  0x53   : > { %1019 = vmatpush3.msra.mxu0 %v300_v3  ;;  %v279_v23 = vld [vmem:[#allocation2 + $0x38] sm:$0xff]  ;;  %v280_v24 = vld [vmem:[#allocation2 + $0x40] sm:$0xff]  ;;  %v281_v25 = vld [vmem:[#allocation2 + $0x48] sm:$0xff] }
  0x54   : > { %1020 = vmatprep.subr.mxu0 %v299_v5  ;;  %v282_v26 = vld [vmem:[#allocation2 + $0x50] sm:$0xff]  ;;  %v283_v27 = vld [vmem:[#allocation2 + $0x58] sm:$0xff]  ;;  %v284_v28 = vld [vmem:[#allocation2 + $0x60] sm:$0xff] }
  0x55   : > { %1021 = vmatpush3.msra.mxu0 %v299_v5  ;;  %v285_v29 = vld [vmem:[#allocation2 + $0x68] sm:$0xff]  ;;  %v286_v30 = vld [vmem:[#allocation2 + $0x70] sm:$0xff]  ;;  %v287_v31 = vld [vmem:[#allocation2 + $0x78] sm:$0xff] }
  0x56   : > { %1022 = vmatprep.subr.mxu0 %v298_v6  ;;  %v502_v32 = vld [vmem:[#allocation6] sm:$0xff]  ;;  %v503_v49 = vld [vmem:[#allocation6 + $0x8] sm:$0xff]  ;;  %v504_v50 = vld [vmem:[#allocation6 + $0x10] sm:$0xff] }
  0x57   : > { %1023 = vmatpush3.msra.mxu0 %v298_v6  ;;  %1100 = vmatprep.mubr.f32.mxu1 %v502_v32  ;;  %v505_v51 = vld [vmem:[#allocation6 + $0x18] sm:$0xff]  ;;  %v506_v52 = vld [vmem:[#allocation6 + $0x20] sm:$0xff]  ;;  %v507_v53 = vld [vmem:[#allocation6 + $0x28] sm:$0xff] }
  0x58   : > { %1024 = vmatprep.subr.mxu0 %v297_v7  ;;  %v508_v54 = vld [vmem:[#allocation6 + $0x30] sm:$0xff]  ;;  %v509_v55 = vld [vmem:[#allocation6 + $0x38] sm:$0xff]  ;;  %v510_v56 = vld [vmem:[#allocation6 + $0x40] sm:$0xff] }
  0x59   : > { %1025 = vmatpush3.msra.mxu0 %v297_v7  ;;  %v511_v57 = vld [vmem:[#allocation6 + $0x48] sm:$0xff]  ;;  %v512_v58 = vld [vmem:[#allocation6 + $0x50] sm:$0xff]  ;;  %v513_v59 = vld [vmem:[#allocation6 + $0x58] sm:$0xff] }
  0x5a   : > { %1026 = vmatprep.subr.mxu0 %v296_v8  ;;  %v514_v60 = vld [vmem:[#allocation6 + $0x60] sm:$0xff]  ;;  %v515_v61 = vld [vmem:[#allocation6 + $0x68] sm:$0xff]  ;;  %v516_v62 = vld [vmem:[#allocation6 + $0x70] sm:$0xff] }
  0x5b   : > { %1027 = vmatpush3.msra.mxu0 %v296_v8  ;;  %v517_v63 = vld [vmem:[#allocation6 + $0x78] sm:$0xff]  ;;  %v938_v0 = vld [vmem:[%s242_s26] ss:$0 sm:$0xff] }
  0x5c   : > { %1028 = vmatprep.subr.mxu0 %v295_v9 }
  0x5d   : > { %1029 = vmatpush3.msra.mxu0 %v295_v9 }
  0x5e   : > { %1030 = vmatprep.subr.mxu0 %v294_v10 }
  0x5f   : > { %1031 = vmatpush3.msra.mxu0 %v294_v10 }
  0x60   : > { %1032 = vmatprep.subr.mxu0 %v293_v11 }
  0x61   : > { %1033 = vmatpush3.msra.mxu0 %v293_v11 }
  0x62   : > { %1034 = vmatprep.subr.mxu0 %v292_v12 }
  0x63   : > { %1035 = vmatpush3.msra.mxu0 %v292_v12 }
  0x64   : > { %1036 = vmatprep.subr.mxu0 %v291_v13 }
  0x65   : > { %1037 = vmatpush3.msra.mxu0 %v291_v13 }
  0x66   : > { %1038 = vmatprep.subr.mxu0 %v290_v14 }
  0x67   : > { %1039 = vmatpush3.msra.mxu0 %v290_v14 }
  0x68   : > { %1040 = vmatprep.subr.mxu0 %v289_v15 }
  0x69   : > { %1041 = vmatpush3.msra.mxu0 %v289_v15 }
  0x6a   : > { %1042 = vmatprep.subr.mxu0 %v288_v16 }
  0x6b   : > { %1043 = vmatpush3.msra.mxu0 %v288_v16 }
  0x6c   : > { %1045 = vmatmul.mubr.f32.vlgmr.msra.gmra.mxu0 %v273_v17 }
  0x6d   : > { %1047 = vmatprep.mubr.f32.mxu0 %v274_v18 }
  0x70   : > { %1048 = vmatmul.mubr.f32.gmra.mxu0 %v275_v19 }
  0x71   : > { %1050 = vmatprep.mubr.f32.mxu0 %v276_v20 }
  0x74   : > { %1051 = vmatmul.mubr.f32.gmra.mxu0 %v277_v21 }
  0x75   : > { %1053 = vmatprep.mubr.f32.mxu0 %v278_v22 }
  0x78   : > { %1054 = vmatmul.mubr.f32.gmra.mxu0 %v279_v23 }
  0x79   : > { %1056 = vmatprep.mubr.f32.mxu0 %v280_v24 }
  0x7c   : > { %1057 = vmatmul.mubr.f32.gmra.mxu0 %v281_v25 }
  0x7d   : > { %1059 = vmatprep.mubr.f32.mxu0 %v282_v26 }
  0x80   : > { %1060 = vmatmul.mubr.f32.gmra.mxu0 %v283_v27 }
  0x81   : > { %1062 = vmatprep.mubr.f32.mxu0 %v284_v28 }
  0x84   : > { %1063 = vmatmul.mubr.f32.gmra.mxu0 %v285_v29 }
  0x85   : > { %1065 = vmatprep.mubr.f32.mxu0 %v286_v30 }
  0x88   : > { %1066 = vmatmul.mubr.f32.gmra.mxu0 %v287_v31 }
 0x12c   : > { %v1046_v33 = vpop.f32.mrf.mxu0 }
 0x12e   : > { %v370_v34 = vpop.f32.mrf.mxu0 }
 0x130   : > { %v1049_v35 = vpop.f32.mrf.mxu0 }
 0x132   : > { %v380_v36 = vpop.f32.mrf.mxu0 }
 0x134   : > { %v1052_v37 = vpop.f32.mrf.mxu0 }
 0x136   : > { %v390_v38 = vpop.f32.mrf.mxu0 }
 0x138   : > { %v1055_v39 = vpop.f32.mrf.mxu0 }
 0x13a   : > { %v400_v40 = vpop.f32.mrf.mxu0 }
 0x13c   : > { %v1058_v41 = vpop.f32.mrf.mxu0 }
 0x13e   : > { %v410_v42 = vpop.f32.mrf.mxu0 }
 0x140   : > { %v1061_v43 = vpop.f32.mrf.mxu0 }
 0x142   : > { %v420_v44 = vpop.f32.mrf.mxu0 }
 0x144   : > { %v1064_v45 = vpop.f32.mrf.mxu0 }
 0x146   : > { %v430_v46 = vpop.f32.mrf.mxu0 }
 0x148   : > { %v1067_v47 = vpop.f32.mrf.mxu0 }
 0x149   : > { %1068 = vmatprep.subr.mxu1 %v1067_v47 }
 0x14a   : > { %v440_v48 = vpop.f32.mrf.mxu0  ;;  %1069 = vmatpush3.msra.mxu1 %v1067_v47 }
 0x14b   : > { %1070 = vmatprep.subr.mxu1 %v440_v48 }
 0x14c   : > { %1071 = vmatpush3.msra.mxu1 %v440_v48 }
 0x14d   : > { %1072 = vmatprep.subr.mxu1 %v1064_v45 }
 0x14e   : > { %1073 = vmatpush3.msra.mxu1 %v1064_v45 }
 0x14f   : > { %1074 = vmatprep.subr.mxu1 %v430_v46 }
 0x150   : > { %1075 = vmatpush3.msra.mxu1 %v430_v46 }
 0x151   : > { %1076 = vmatprep.subr.mxu1 %v1061_v43 }
 0x152   : > { %1077 = vmatpush3.msra.mxu1 %v1061_v43 }
 0x153   : > { %1078 = vmatprep.subr.mxu1 %v420_v44 }
 0x154   : > { %1079 = vmatpush3.msra.mxu1 %v420_v44 }
 0x155   : > { %1080 = vmatprep.subr.mxu1 %v1058_v41 }
 0x156   : > { %1081 = vmatpush3.msra.mxu1 %v1058_v41 }
 0x157   : > { %1082 = vmatprep.subr.mxu1 %v410_v42 }
 0x158   : > { %1083 = vmatpush3.msra.mxu1 %v410_v42 }
 0x159   : > { %1084 = vmatprep.subr.mxu1 %v1055_v39 }
 0x15a   : > { %1085 = vmatpush3.msra.mxu1 %v1055_v39 }
 0x15b   : > { %1086 = vmatprep.subr.mxu1 %v400_v40 }
 0x15c   : > { %1087 = vmatpush3.msra.mxu1 %v400_v40 }
 0x15d   : > { %1088 = vmatprep.subr.mxu1 %v1052_v37 }
 0x15e   : > { %1089 = vmatpush3.msra.mxu1 %v1052_v37 }
 0x15f   : > { %1090 = vmatprep.subr.mxu1 %v390_v38 }
 0x160   : > { %1091 = vmatpush3.msra.mxu1 %v390_v38 }
 0x161   : > { %1092 = vmatprep.subr.mxu1 %v1049_v35 }
 0x162   : > { %1093 = vmatpush3.msra.mxu1 %v1049_v35 }
 0x163   : > { %1094 = vmatprep.subr.mxu1 %v380_v36 }
 0x164   : > { %1095 = vmatpush3.msra.mxu1 %v380_v36 }
 0x165   : > { %1096 = vmatprep.subr.mxu1 %v1046_v33 }
 0x166   : > { %1097 = vmatpush3.msra.mxu1 %v1046_v33 }
 0x167   : > { %1098 = vmatprep.subr.mxu1 %v370_v34 }
 0x168   : > { %1099 = vmatpush3.msra.mxu1 %v370_v34 }
 0x169   : > { %1101 = vmatmul.mubr.f32.vlgmr.msra.gmra.mxu1 %v503_v49 }
 0x16a   : > { %1103 = vmatprep.mubr.f32.mxu1 %v504_v50 }
 0x16d   : > { %1104 = vmatmul.mubr.f32.gmra.mxu1 %v505_v51 }
 0x16e   : > { %1106 = vmatprep.mubr.f32.mxu1 %v506_v52 }
 0x171   : > { %1107 = vmatmul.mubr.f32.gmra.mxu1 %v507_v53 }
 0x172   : > { %1109 = vmatprep.mubr.f32.mxu1 %v508_v54 }
 0x175   : > { %1110 = vmatmul.mubr.f32.gmra.mxu1 %v509_v55 }
 0x176   : > { %1112 = vmatprep.mubr.f32.mxu1 %v510_v56 }
 0x179   : > { %1113 = vmatmul.mubr.f32.gmra.mxu1 %v511_v57 }
 0x17a   : > { %1115 = vmatprep.mubr.f32.mxu1 %v512_v58 }
 0x17d   : > { %1116 = vmatmul.mubr.f32.gmra.mxu1 %v513_v59 }
 0x17e   : > { %1118 = vmatprep.mubr.f32.mxu1 %v514_v60 }
 0x181   : > { %1119 = vmatmul.mubr.f32.gmra.mxu1 %v515_v61 }
 0x182   : > { %1121 = vmatprep.mubr.f32.mxu1 %v516_v62 }
 0x185   : > { %1122 = vmatmul.mubr.f32.gmra.mxu1 %v517_v63 }
 0x229   : > { %v1102_v1 = vpop.f32.mrf.mxu1 }
 0x22a   : > { %v1552_v2 = vadd.f32 %v1102_v1, %v938_v0 }
 0x22b   : > { %v601_v3 = vpop.f32.mrf.mxu1 }
 0x22c   : > { %v1554_v4 = vadd.f32 %v938_v0, %v601_v3 }
 0x22d   : > { %v1105_v5 = vpop.f32.mrf.mxu1 }
 0x22e   : > { %v1556_v6 = vadd.f32 %v1105_v5, %v938_v0 }
 0x22f   : > { %v611_v7 = vpop.f32.mrf.mxu1 }
 0x230   : > { %v1558_v8 = vadd.f32 %v938_v0, %v611_v7 }
 0x231   : > { %v1108_v9 = vpop.f32.mrf.mxu1 }
 0x232   : > { %v1560_v10 = vadd.f32 %v1108_v9, %v938_v0 }
 0x233   : > { %v621_v11 = vpop.f32.mrf.mxu1 }
 0x234   : > { %v742_v12 = vadd.f32 %v938_v0, %v621_v11 }
 0x235   : > { %v1111_v13 = vpop.f32.mrf.mxu1 }
 0x236   : > { %v745_v14 = vadd.f32 %v1111_v13, %v938_v0 }
 0x237   : > { %v631_v15 = vpop.f32.mrf.mxu1 }
 0x238   : > { %v744_v16 = vadd.f32 %v938_v0, %v631_v15 }
 0x239   : > { %v1114_v17 = vpop.f32.mrf.mxu1 }
 0x23a   : > { %v747_v18 = vadd.f32 %v1114_v17, %v938_v0 }
 0x23b   : > { %v641_v19 = vpop.f32.mrf.mxu1 }
 0x23c   : > { %v746_v20 = vadd.f32 %v938_v0, %v641_v19 }
 0x23d   : > { %v1117_v21 = vpop.f32.mrf.mxu1 }
 0x23e   : > { %v749_v22 = vadd.f32 %v1117_v21, %v938_v0 }
 0x23f   : > { %v651_v23 = vpop.f32.mrf.mxu1 }
 0x240   : > { %v748_v24 = vadd.f32 %v938_v0, %v651_v23 }
 0x241   : > { %v1120_v25 = vpop.f32.mrf.mxu1 }
 0x242   : > { %v751_v26 = vadd.f32 %v1120_v25, %v938_v0 }
 0x243   : > { %v661_v27 = vpop.f32.mrf.mxu1 }
 0x244   : > { %v750_v28 = vadd.f32 %v938_v0, %v661_v27  ;;  %757 = sbr.rel (%p939_p2) target bundleno = 595 (0x253), region = 64 }
 0x245   : > { %v1123_v29 = vpop.f32.mrf.mxu1 }
 0x246   : > { %v753_v30 = vadd.f32 %v1123_v29, %v938_v0 }
 0x247   : > { %v671_v31 = vpop.f32.mrf.mxu1 }
 0x248   : > { %v752_v32 = vadd.f32 %v938_v0, %v671_v31 }
 0x249   : > { %v758_v33 = vmax.f32 %v1554_v4, 0.0  ;;  %v759_v34 = vmax.f32 %v1552_v2, 0.0  ;;  %v760_v35 = vmax.f32 %v1558_v8, 0.0  ;;  %v761_v36 = vmax.f32 %v1556_v6, 0.0 }
 0x24a   : > { %v762_v37 = vmax.f32 %v742_v12, 0.0  ;;  %v763_v38 = vmax.f32 %v1560_v10, 0.0  ;;  %v764_v39 = vmax.f32 %v744_v16, 0.0  ;;  %v765_v40 = vmax.f32 %v745_v14, 0.0 }
 0x24b   : > { %776 = vst [vmem:[#allocation2] sm:$0xff] %v758_v33  ;;  %777 = vst [vmem:[#allocation2 + $0x8] sm:$0xff] %v759_v34  ;;  %v766_v41 = vmax.f32 %v746_v20, 0.0  ;;  %v767_v42 = vmax.f32 %v747_v18, 0.0  ;;  %v768_v43 = vmax.f32 %v748_v24, 0.0  ;;  %v769_v44 = vmax.f32 %v749_v22, 0.0 }
 0x24c   : > { %778 = vst [vmem:[#allocation2 + $0x10] sm:$0xff] %v760_v35  ;;  %779 = vst [vmem:[#allocation2 + $0x18] sm:$0xff] %v761_v36  ;;  %v770_v45 = vmax.f32 %v750_v28, 0.0  ;;  %v771_v46 = vmax.f32 %v751_v26, 0.0  ;;  %v772_v47 = vmax.f32 %v752_v32, 0.0  ;;  %v773_v48 = vmax.f32 %v753_v30, 0.0 }
 0x24d   : > { %780 = vst [vmem:[#allocation2 + $0x20] sm:$0xff] %v762_v37  ;;  %781 = vst [vmem:[#allocation2 + $0x28] sm:$0xff] %v763_v38 }
 0x24e   : > { %782 = vst [vmem:[#allocation2 + $0x30] sm:$0xff] %v764_v39  ;;  %783 = vst [vmem:[#allocation2 + $0x38] sm:$0xff] %v765_v40 }
 0x24f   : > { %784 = vst [vmem:[#allocation2 + $0x40] sm:$0xff] %v766_v41  ;;  %785 = vst [vmem:[#allocation2 + $0x48] sm:$0xff] %v767_v42 }
 0x250   : > { %786 = vst [vmem:[#allocation2 + $0x50] sm:$0xff] %v768_v43  ;;  %787 = vst [vmem:[#allocation2 + $0x58] sm:$0xff] %v769_v44 }
 0x251   : > { %788 = vst [vmem:[#allocation2 + $0x60] sm:$0xff] %v770_v45  ;;  %789 = vst [vmem:[#allocation2 + $0x68] sm:$0xff] %v771_v46 }
 0x252   : > { %790 = vst [vmem:[#allocation2 + $0x70] sm:$0xff] %v772_v47  ;;  %791 = vst [vmem:[#allocation2 + $0x78] sm:$0xff] %v773_v48 }
 0x253 PF: > { %p940_p3 = scmp.ne.s32.totalorder %s1360_s18, 2 }
 0x255   : > { %795 = sbr.rel (%p940_p3) target bundleno = 610 (0x262), region = 68 }
 0x25a   : > { %796 = vst [vmem:[#allocation11] sm:$0xff] %v1554_v4  ;;  %797 = vst [vmem:[#allocation11 + $0x8] sm:$0xff] %v1552_v2 }
 0x25b   : > { %798 = vst [vmem:[#allocation11 + $0x10] sm:$0xff] %v1558_v8  ;;  %799 = vst [vmem:[#allocation11 + $0x18] sm:$0xff] %v1556_v6 }
 0x25c   : > { %800 = vst [vmem:[#allocation11 + $0x20] sm:$0xff] %v742_v12  ;;  %801 = vst [vmem:[#allocation11 + $0x28] sm:$0xff] %v1560_v10 }
 0x25d   : > { %802 = vst [vmem:[#allocation11 + $0x30] sm:$0xff] %v744_v16  ;;  %803 = vst [vmem:[#allocation11 + $0x38] sm:$0xff] %v745_v14 }
 0x25e   : > { %804 = vst [vmem:[#allocation11 + $0x40] sm:$0xff] %v746_v20  ;;  %805 = vst [vmem:[#allocation11 + $0x48] sm:$0xff] %v747_v18 }
 0x25f   : > { %806 = vst [vmem:[#allocation11 + $0x50] sm:$0xff] %v748_v24  ;;  %807 = vst [vmem:[#allocation11 + $0x58] sm:$0xff] %v749_v22 }
 0x260   : > { %808 = vst [vmem:[#allocation11 + $0x60] sm:$0xff] %v750_v28  ;;  %809 = vst [vmem:[#allocation11 + $0x68] sm:$0xff] %v751_v26 }
 0x261   : > { %810 = vst [vmem:[#allocation11 + $0x70] sm:$0xff] %v752_v32  ;;  %811 = vst [vmem:[#allocation11 + $0x78] sm:$0xff] %v753_v30 }
 0x262 PF: > { %p1576_p6 = scmp.eq.s32.totalorder %s927_s21, 2  ;;  %s1375_s8 = smov [#allocation11]  }
 0x263   : > { %s821_s9 = sshll.u32 %s1375_s8, 4  ;;  %s822_s9 = int_to_ptr.vmem [resolvable:$true] %s821_s9 }
 0x264   : > { %s1282_s14 = scalar_lea.vmem %s822_s9, 2048  ;;  %p1289_p10 = scmp.lt.s32.totalorder %s822_s9, %s822_s9 }
 0x265   : > { %p1283_p8 = scmp.ne.s32.totalorder %s822_s9, %s1282_s14  ;;  %p1290_p1 = scmp.lt.s32.totalorder %s1282_s14, %s1282_s14 }
 0x267   : > { %p1284_p9 = pnand %p1283_p8, %p1576_p6  ;;  %p1291_p4 = por %p1290_p1, %p1289_p10 }
 0x269   : > { %p1285_p5 = pneg %p1284_p9 }
 0x26b   : > { %p1292_p11 = pnand %p1291_p4, %p1285_p5 }
 0x26d   : > { %1295 = shalt.err (!%p1292_p11)
}
 0x26e   : > { %s1376_s10 = smov 128   ;;  %s1377_s21 = smov 8  }
 0x26f   : > { %1133 = dma.vmem_to_hbm [thread:$0]  (%p1576_p6), %s822_s9, 2048, %s1613_s4, [#allocation8], %s1376_s10, %s1376_s10, %s1377_s21  }
 0x270   : > { %1343 = dma.done.wait (%p1576_p6), [#allocation8], 2048  }
 0x271   : > { %1345 = vsyncadd (%p1576_p6), [#allocation8], 4294965248 }
 0x272 PF: > { %s19_s20 = sadd.s32 1, %s1368_s20   ;;  %s1620_s15 = smov %s1352_s16 }
 0x273   : > { %p16_p7 = scmp.ge.s32.totalorder %s19_s20, 5   ;;  %s1621_s16 = smov %s1356_s17 }
 0x274   : > { %s1622_s17 = smov %s1482_s13  ;;  %s1623_s18 = smov %s1364_s19 }
 0x275   : > { %s1624_s19 = smov %s1626_s28  ;;  %18 = sbr.rel (!%p16_p7) target bundleno = 6 (0x6), region = 111 }
 0x27a   :  { %837 = vsyncpa [#allocation7], 1 }
 0x27b   :  { %839 = vsyncpa [#allocation7 + $0x1], 1 }
 0x27c   :  { %840 = vsyncpa [#allocation10], 1 }
 0x27d   :  { %842 = vsyncpa [#allocation10 + $0x1], 1 }
 0x27e   :  { %843 = vsyncpa [#allocation8], 1 }
 0x27f   :  { %845 = vsyncpa [#allocation8 + $0x1], 1 }
 0x280   :  { %846 = vsyncmov [#allocation5] }
 0x283   :  { %s847_s22 = vpop.sfrf %846 }
 0x284   :  { %p945_p12 = scmp.ne.s32.totalorder %s847_s22, 0 }
 0x286   :  { %851 = shalt.err (%p945_p12)  }

</bundles_post_ra>
